<compile_context>
chip_gen: v7x
topology: tpu7x:2x2x1
jax: 0.10.0
libtpu: 0.0.40
codegen_flags: <defaults>
</compile_context>

<pallas_src>
import jax
import jax.numpy as jnp
from jax.experimental import pallas as pl
from jax.experimental.pallas import tpu as pltpu


def _attention_kernel(x_ref, w1_ref, b1_ref, w2_ref, b2_ref, o_ref):
    # x_ref:  (1, C, TL)  current (batch, position-tile) block, NCL layout
    # w1_ref: (Ch, C)     first 1x1 conv weight (PyTorch layout, k squeezed)
    # b1_ref: (Ch, 1)
    # w2_ref: (Ch, 1)     second 1x1 conv weight as a column
    # b2_ref: (1, 1)
    x = x_ref[0]  # (C, TL)

    # Conv1d(C -> C//2, k=1) + ReLU  ==  relu(W1 @ x + b1)     -> (Ch, TL)
    h = jnp.dot(w1_ref[...], x, preferred_element_type=jnp.float32) + b1_ref[...]
    h = jnp.maximum(h, 0.0)

    # Conv1d(C//2 -> 1, k=1) + Sigmoid as a VPU multiply + sublane reduction:
    #   a = sigmoid(sum_ch w2[ch] * h[ch, :] + b2)             -> (1, TL)
    a = jnp.sum(h * w2_ref[...], axis=0, keepdims=True) + b2_ref[...]
    a = jax.nn.sigmoid(a)

    # Broadcast-multiply the attention over the channel (sublane) axis.
    o_ref[0] = (x * a.astype(x.dtype)).astype(o_ref.dtype)


def _pick_position_tile(L, C, dtype_bytes=4, block_budget_bytes=2 << 20):
    """Largest multiple-of-128 tile that divides L and keeps a single
    (C, TL) block under the budget (double-buffered in+out => 4 blocks live,
    comfortably inside scoped VMEM on v5e/v6e/v7x). Falls back to full L."""
    max_tl = max(128, block_budget_bytes // max(1, C * dtype_bytes))
    for tl in (2048, 1024, 512, 256, 128):
        if tl <= max_tl and L % tl == 0:
            return tl
    return L  # full-extent block is always a legal block shape


def attention_forward(x_ncl, w1, b1, w2, b2):
    """x_ncl: (N, C, L) float32, matching PyTorch Conv1d input layout.

    w1: (C//2, C), b1: (C//2,)   -- first Conv1d (kernel_size=1, squeezed)
    w2: (1, C//2), b2: (1,)      -- second Conv1d
    Returns (N, C, L).
    """
    N, C, L = x_ncl.shape
    Ch = C // 2

    # Reshape the tiny parameters into 2-D, kernel-friendly layouts.
    w1_2d = w1.reshape(Ch, C)                  # (Ch, C)
    b1_2d = b1.reshape(Ch, 1)                  # (Ch, 1)
    w2_col = w2.reshape(1, Ch).T               # (Ch, 1)
    b2_2d = b2.reshape(1, 1)                   # (1, 1)

    TL = _pick_position_tile(L, C, x_ncl.dtype.itemsize)
    n_l_tiles = L // TL

    itemsize = x_ncl.dtype.itemsize
    cost = pl.CostEstimate(
        flops=N * L * (2 * C * Ch + 2 * Ch + C),
        transcendentals=N * L,
        bytes_accessed=2 * N * C * L * itemsize
        + (w1_2d.size + b1_2d.size + w2_col.size + b2_2d.size) * 4,
    )

    out = pl.pallas_call(
        _attention_kernel,
        out_shape=jax.ShapeDtypeStruct((N, C, L), x_ncl.dtype),
        grid_spec=pltpu.PrefetchScalarGridSpec(
            num_scalar_prefetch=0,
            grid=(N, n_l_tiles),
            in_specs=[
                pl.BlockSpec((1, C, TL), lambda n, l: (n, 0, l)),
                pl.BlockSpec((Ch, C), lambda n, l: (0, 0)),
                pl.BlockSpec((Ch, 1), lambda n, l: (0, 0)),
                pl.BlockSpec((Ch, 1), lambda n, l: (0, 0)),
                pl.BlockSpec((1, 1), lambda n, l: (0, 0)),
            ],
            out_specs=pl.BlockSpec((1, C, TL), lambda n, l: (n, 0, l)),
        ),
        compiler_params=pltpu.CompilerParams(
            dimension_semantics=("parallel", "parallel"),
        ),
        cost_estimate=cost,
    )(x_ncl, w1_2d, b1_2d, w2_col, b2_2d)

    return out


def _reference_forward(x_ncl, w1, b1, w2, b2):
    """Pure-JAX reference identical to the PyTorch module semantics."""
    h = jnp.einsum("ncl,oc->nol", x_ncl, w1) + b1[None, :, None]
    h = jnp.maximum(h, 0.0)
    a = jnp.einsum("ncl,oc->nol", h, w2) + b2[None, :, None]
    a = jax.nn.sigmoid(a)                       # (N, 1, L)
    return x_ncl * a


if __name__ == "__main__":
    # Small shapes consistent with the module: batch=2, in_channels=32, seq=128.
    N, C, L = 2, 32, 128
    Ch = C // 2

    key = jax.random.PRNGKey(0)
    kx, kw1, kb1, kw2, kb2 = jax.random.split(key, 5)

    x = jax.random.normal(kx, (N, C, L), dtype=jnp.float32)
    # Deterministic "init" of Conv1d params (kernel_size=1 weights squeezed).
    w1 = jax.random.normal(kw1, (Ch, C), dtype=jnp.float32) * 0.1
    b1 = jax.random.normal(kb1, (Ch,), dtype=jnp.float32) * 0.1
    w2 = jax.random.normal(kw2, (1, Ch), dtype=jnp.float32) * 0.1
    b2 = jax.random.normal(kb2, (1,), dtype=jnp.float32) * 0.1

    out = attention_forward(x, w1, b1, w2, b2)
    out = jax.block_until_ready(out)

    ref = _reference_forward(x, w1, b1, w2, b2)
    assert out.shape == (N, C, L)
    assert jnp.allclose(out, ref, atol=1e-5, rtol=1e-5), (
        f"max abs err = {jnp.max(jnp.abs(out - ref))}"
    )

    print("KERNEL_OK")
</pallas_src>

<mosaic_0001>
module attributes {stable_mosaic.version = 11 : i64} {
  func.func @_attention_kernel(%arg0: i32, %arg1: i32, %arg2: memref<1x32x128xf32, #tpu.memory_space<vmem>>, %arg3: memref<16x32xf32, #tpu.memory_space<vmem>>, %arg4: memref<16x1xf32, #tpu.memory_space<vmem>>, %arg5: memref<16x1xf32, #tpu.memory_space<vmem>>, %arg6: memref<1x1xf32, #tpu.memory_space<vmem>>, %arg7: memref<1x32x128xf32, #tpu.memory_space<vmem>>) attributes {dimension_semantics = [#tpu.dimension_semantics<parallel>, #tpu.dimension_semantics<parallel>], iteration_bounds = array<i64: 2, 1>, scalar_prefetch = 0 : i64, scratch_operands = 0 : i64, tpu.core_type = #tpu.core_type<tc>, window_params = [{transform_indices = @transform_0, window_bounds = array<i64: 1, 32, 128>}, {pipeline_mode = #tpu.pipeline_mode<synchronous>, transform_indices = @transform_1, window_bounds = array<i64: 16, 32>}, {pipeline_mode = #tpu.pipeline_mode<synchronous>, transform_indices = @transform_2, window_bounds = array<i64: 16, 1>}, {pipeline_mode = #tpu.pipeline_mode<synchronous>, transform_indices = @transform_3, window_bounds = array<i64: 16, 1>}, {pipeline_mode = #tpu.pipeline_mode<synchronous>, transform_indices = @transform_4, window_bounds = array<i64: 1, 1>}, {transform_indices = @transform_5, window_bounds = array<i64: 1, 32, 128>}]} {
    %c0 = arith.constant 0 : index
    %c0_0 = arith.constant 0 : index
    %c0_1 = arith.constant 0 : index
    %0 = vector.load %arg2[%c0, %c0_0, %c0_1] : memref<1x32x128xf32, #tpu.memory_space<vmem>>, vector<1x32x128xf32>
    %1 = vector.shape_cast %0 : vector<1x32x128xf32> to vector<32x128xf32>
    %c0_2 = arith.constant 0 : index
    %c0_3 = arith.constant 0 : index
    %2 = vector.load %arg3[%c0_2, %c0_3] : memref<16x32xf32, #tpu.memory_space<vmem>>, vector<16x32xf32>
    %cst = arith.constant dense<0.000000e+00> : vector<16x128xf32>
    %3 = tpu.matmul %2, %1, %cst {dimension_numbers = #tpu.dot_dimension_numbers<[1], [0], [0], [1], [0, 0, 1, 1], [], []>} : vector<16x32xf32>, vector<32x128xf32>, vector<16x128xf32> -> vector<16x128xf32>
    %c0_4 = arith.constant 0 : index
    %c0_5 = arith.constant 0 : index
    %4 = vector.load %arg4[%c0_4, %c0_5] : memref<16x1xf32, #tpu.memory_space<vmem>>, vector<16x1xf32>
    %5 = vector.broadcast %4 : vector<16x1xf32> to vector<16x128xf32>
    %6 = arith.addf %3, %5 : vector<16x128xf32>
    %cst_6 = arith.constant 0.000000e+00 : f32
    %7 = vector.broadcast %cst_6 : f32 to vector<16x128xf32>
    %8 = arith.maximumf %6, %7 : vector<16x128xf32>
    %c0_7 = arith.constant 0 : index
    %c0_8 = arith.constant 0 : index
    %9 = vector.load %arg5[%c0_7, %c0_8] : memref<16x1xf32, #tpu.memory_space<vmem>>, vector<16x1xf32>
    %10 = vector.broadcast %9 : vector<16x1xf32> to vector<16x128xf32>
    %11 = arith.mulf %8, %10 : vector<16x128xf32>
    %cst_9 = arith.constant dense<0.000000e+00> : vector<128xf32>
    %12 = vector.multi_reduction <add>, %11, %cst_9 [0] : vector<16x128xf32> to vector<128xf32>
    %13 = vector.shape_cast %12 : vector<128xf32> to vector<1x128xf32>
    %c0_10 = arith.constant 0 : index
    %c0_11 = arith.constant 0 : index
    %14 = vector.load %arg6[%c0_10, %c0_11] : memref<1x1xf32, #tpu.memory_space<vmem>>, vector<1x1xf32>
    %15 = vector.broadcast %14 : vector<1x1xf32> to vector<1x128xf32>
    %16 = arith.addf %13, %15 : vector<1x128xf32>
    %17 = arith.negf %16 : vector<1x128xf32>
    %18 = math.exp %17 : vector<1x128xf32>
    %cst_12 = arith.constant 1.000000e+00 : f32
    %19 = vector.broadcast %cst_12 : f32 to vector<1x128xf32>
    %20 = arith.addf %19, %18 : vector<1x128xf32>
    %21 = arith.divf %19, %20 : vector<1x128xf32>
    %22 = vector.broadcast %21 : vector<1x128xf32> to vector<32x128xf32>
    %23 = arith.mulf %1, %22 : vector<32x128xf32>
    %c0_13 = arith.constant 0 : index
    %c0_14 = arith.constant 0 : index
    %c0_15 = arith.constant 0 : index
    %24 = vector.load %arg7[%c0_13, %c0_14, %c0_15] : memref<1x32x128xf32, #tpu.memory_space<vmem>>, vector<1x32x128xf32>
    %25 = vector.shape_cast %24 : vector<1x32x128xf32> to vector<32x128xf32>
    %26 = vector.shape_cast %23 : vector<32x128xf32> to vector<1x32x128xf32>
    tpu.vector_store %arg7[%c0_13, %c0_14, %c0_15], %26 {strides = array<i32>} : memref<1x32x128xf32, #tpu.memory_space<vmem>>, vector<1x32x128xf32>,
    return
  }
  func.func @transform_0(%arg0: i32, %arg1: i32) -> (i32, i32, i32) {
    %c0_i32 = arith.constant 0 : i32
    %c0_i32_0 = arith.constant 0 : i32
    return %arg0, %c0_i32, %arg1 : i32, i32, i32
  }
  func.func @transform_1(%arg0: i32, %arg1: i32) -> (i32, i32) {
    %c0_i32 = arith.constant 0 : i32
    %c0_i32_0 = arith.constant 0 : i32
    %c0_i32_1 = arith.constant 0 : i32
    return %c0_i32, %c0_i32_0 : i32, i32
  }
  func.func @transform_2(%arg0: i32, %arg1: i32) -> (i32, i32) {
    %c0_i32 = arith.constant 0 : i32
    %c0_i32_0 = arith.constant 0 : i32
    %c0_i32_1 = arith.constant 0 : i32
    return %c0_i32, %c0_i32_0 : i32, i32
  }
  func.func @transform_3(%arg0: i32, %arg1: i32) -> (i32, i32) {
    %c0_i32 = arith.constant 0 : i32
    %c0_i32_0 = arith.constant 0 : i32
    %c0_i32_1 = arith.constant 0 : i32
    return %c0_i32, %c0_i32_0 : i32, i32
  }
  func.func @transform_4(%arg0: i32, %arg1: i32) -> (i32, i32) {
    %c0_i32 = arith.constant 0 : i32
    %c0_i32_0 = arith.constant 0 : i32
    %c0_i32_1 = arith.constant 0 : i32
    return %c0_i32, %c0_i32_0 : i32, i32
  }
  func.func @transform_5(%arg0: i32, %arg1: i32) -> (i32, i32, i32) {
    %c0_i32 = arith.constant 0 : i32
    %c0_i32_0 = arith.constant 0 : i32
    return %arg0, %c0_i32, %arg1 : i32, i32, i32
  }
}

</mosaic_0001>

<bundles_post_ra>
// kernel: tpu_custom_call.1
= control target key start
LH: loop header
LB: loop body
LE: loop exit
PB: predicated region body
PF: predicated region fallthrough
CT: control target
= control target key end

     0   :  { %s981_s0 = inlined_call_operand.hbm [shape: f32[2,32,128], index: 0, kind: input, shape index: {}]   ;;  %s982_s1 = inlined_call_operand.vmem [shape: f32[16,32], index: 1, kind: input, shape index: {}]   ;;  %s983_s2 = inlined_call_operand.vmem [shape: f32[16,1], index: 2, kind: input, shape index: {}]   ;;  %s984_s3 = inlined_call_operand.vmem [shape: f32[16,1], index: 3, kind: input, shape index: {}]   ;;  %s985_s4 = inlined_call_operand.<no memory space> [shape: f32[1,1], index: 4, kind: input, shape index: {}]   ;;  %s986_s5 = inlined_call_operand.hbm [shape: f32[2,32,128], index: 5, kind: output, shape index: {}]  }
   0x1   :  { %v10_v0 = vstv %s985_s4 }
   0x2   :  { %11 = vst [vmem:[#allocation2] sm:$0x1] %v10_v0 }
   0x3   :  { %12 = vsyncpa [#allocation4], 0 }
   0x4   :  { %14 = vsyncpa [#allocation4 + $0x1], 0 }
   0x5   :  { %15 = vsyncpa [#allocation5], 0 }
   0x6   :  { %17 = vsyncpa [#allocation5 + $0x1], 0  ;;  %s782_s20 = smov 0   ;;  %s784_s21 = smov 0  }
   0x7   :  { %s786_s22 = smov 0   ;;  %s788_s23 = smov 0  }
   0x8   :  { %s790_s24 = smov 0   ;;  %s792_s25 = smov 0  }
   0x9 LB: > { %s510_s4 = sadd.s32 4294967295, %s740_s25   ;;  %s511_s26 = sadd.s32 4294967294, %s740_s25   ;;  %s740_s25 = sphi %s792_s25, %s23_s25   ;;  %s736_s24 = sphi %s790_s24, %s1001_s24   ;;  %s732_s23 = sphi %s788_s23, %s1000_s23   ;;  %s728_s22 = sphi %s786_s22, %s999_s22   ;;  %s724_s21 = sphi %s784_s21, %s998_s21   ;;  %s720_s20 = sphi %s782_s20, %s997_s20  }
   0xa   : > { %s35_s27 = sadd.s32 1, %s736_s24  ;;  %s44_s28 = sadd.s32 1, %s728_s22 }
   0xb   : > { %p37_p0 = scmp.ge.s32.totalorder %s35_s27, 2  ;;  %p51_p1 = scmp.ne.s32.totalorder %s728_s22, %s724_s21 }
   0xc   : > { %p52_p2 = scmp.eq.s32.totalorder %s740_s25, 0  ;;  %p57_p3 = scmp.ne.s32.totalorder %s724_s21, %s720_s20 }
   0xd   : > { %s1003_s27 = smov (%p37_p0, %s35_s27), 0  ;;  %p58_p5 = scmp.eq.s32.totalorder %s510_s4, 0 }
   0xe   : > { %p823_p4 = por %p52_p2, %p51_p1  ;;  %s39_s30 = ssub.s32 %s736_s24, %s1003_s27 }
   0xf   : > { %p167_p6 = scmp.eq.s32.totalorder %s510_s4, 1  ;;  %p42_p7 = scmp.eq.s32.totalorder %s39_s30, 0 }
  0x10   : > { %p829_p8 = por %p58_p5, %p57_p3  ;;  %p173_p10 = scmp.eq.s32.totalorder %s511_s26, 1 }
  0x11   : > { %p833_p9 = por %p167_p6, %p51_p1  ;;  %p567_p13 = scmp.lt.s32.totalorder %s740_s25, 2 }
  0x12   : > { %s838_s8 = scalar_select %p42_p7, %s728_s22, %s44_s28  }
  0x13   : > { %s990_s7 = scalar_select %p833_p9, 1, 0 }
  0x14   : > { %p840_p11 = por %p173_p10, %p57_p3  ;;  %s205_s10 = sand.u32 1, %s728_s22  }
  0x15   : > { %s514_s11 = sshll.u32 %s205_s10, 5  ;;  %s528_s12 = sshll.u32 %s736_s24, 9 }
  0x16   : > { %s991_s9 = scalar_select %p840_p11, 1, 0 }
  0x17   : > { %s851_s15 = scalar_lea.hbm %s981_s0, %s528_s12  ;;  %s209_s16 = scalar_lea.vmem [#allocation3], %s514_s11 }
  0x18   : > { %s217_s17 = sshll.u32 %s209_s16, 4  ;;  %p857_p0 = pnand %p567_p13, %p823_p4  ;;  %s853_s17 = int_to_ptr.vmem [resolvable:$true] %s217_s17 }
  0x19   : > { %s862_s19 = scalar_lea.sflag [#allocation4], %s205_s10  ;;  %s628_s4 = scalar_lea.hbm %s851_s15, 512 }
  0x1a   : > { %p629_p2 = scmp.ne.s32.totalorder %s851_s15, %s628_s4  ;;  %p630_p3 = pneg %p857_p0 }
  0x1b   : > { %s633_s29 = scalar_lea.hbm %s981_s0, 1024  ;;  %p634_p4 = scmp.lt.u32.totalorder %s851_s15, %s981_s0 }
  0x1c   : > { %p631_p5 = pnand %p630_p3, %p629_p2  ;;  %p635_p7 = scmp.lt.u32.totalorder %s633_s29, %s628_s4 }
  0x1d   : > { %p637_p13 = scmp.lt.u32.totalorder %s628_s4, %s851_s15 }
  0x1e   : > { %p632_p6 = pneg %p631_p5  ;;  %p636_p10 = por %p635_p7, %p634_p4 }
  0x20   : > { %p638_p12 = por %p637_p13, %p636_p10 }
  0x22   : > { %p639_p1 = pnand %p638_p12, %p632_p6 }
  0x24   : > { %642 = shalt.err (!%p639_p1)
}
  0x25   : > { %s643_s10 = scalar_lea.vmem %s853_s17, 512  ;;  %s742_s12 = smov [#allocation3]  }
  0x26   : > { %p644_p2 = scmp.ne.s32.totalorder %s853_s17, %s643_s10  ;;  %s648_s13 = sshll.u32 %s742_s12, 4  ;;  %s649_s13 = int_to_ptr.vmem [resolvable:$false] %s648_s13 }
  0x27   : > { %s650_s14 = scalar_lea.vmem %s649_s13, 1024  ;;  %p651_p9 = scmp.lt.s32.totalorder %s853_s17, %s649_s13 }
  0x28   : > { %p646_p5 = pnand %p644_p2, %p630_p3  ;;  %p652_p4 = scmp.lt.s32.totalorder %s650_s14, %s643_s10 }
  0x2a   : > { %p647_p11 = pneg %p646_p5  ;;  %p653_p7 = por %p652_p4, %p651_p9 }
  0x2c   : > { %p654_p10 = pnand %p653_p7, %p647_p11 }
  0x2e   : > { %657 = shalt.err (!%p654_p10)
}
  0x2f   : > { %s743_s16 = smov 128   ;;  %s744_s4 = smov 8  }
  0x30   : > { %562 = dma.hbm_to_vmem [thread:$0]  (!%p857_p0), %s851_s15, 512, %s853_s17, %s862_s19, %s743_s16, %s743_s16, %s744_s4  }
  0x31   : > { %p225_p12 = scmp.lt.s32.totalorder %s740_s25, 3  ;;  %p993_p1 = scmp.ge.s32.totalorder %s740_s25, 1 }
  0x33   : > { %p226_p3 = pnand %p993_p1, %p225_p12 }
  0x34   : > { %s894_s26 = sand.u32 (!%p226_p3), 1, %s724_s21  }
  0x35   : > { %229 = sbr.rel (%p226_p3) target bundleno = 351 (0x15f), region = 40  ;;  %s518_s28 = sshll.u32 (!%p226_p3), %s894_s26, 5 }
  0x36   : > { %s232_s29 = scalar_lea.sflag (!%p226_p3), [#allocation4], %s894_s26  ;;  %s235_s30 = scalar_lea.vmem (!%p226_p3), [#allocation3], %s518_s28 }
  0x3c   : > { %711 = dma.done.wait (%p829_p8), %s232_s29, 512  }
  0x3d   : > { %713 = vsyncadd (%p829_p8), %s232_s29, 4294966784  ;;  %v745_v1 = vmov 0   ;;  %vm280_vm0 = vcmask 261120   ;;  %v262_v2 = vld [vmem:[%s235_s30] sm:$0xff]  ;;  %v263_v3 = vld [vmem:[%s235_s30 + $0x8] sm:$0xff]  ;;  %v391_v27 = vlaneseq  ;;  %s529_s29 = sshll.u32 %s732_s23, 9 }
  0x3e   : > { %622 = vset.pattern.permute.xlu0 %v745_v1  ;;  %623 = vset.pattern.permute.xlu1 %v745_v1  ;;  %v264_v4 = vld [vmem:[%s235_s30 + $0x10] sm:$0xff]  ;;  %v547_v5 = vpack.c.bf16 %v263_v3, %v262_v2  ;;  %v265_v6 = vld [vmem:[%s235_s30 + $0x18] sm:$0xff]  ;;  %v269_v11 = vld [vmem:[%s983_s2 + $0x8] sm:$0xff]  ;;  %s261_s30 = scalar_lea.vmem [#allocation6], %s518_s28  ;;  %s930_s19 = scalar_lea.hbm %s986_s5, %s529_s29 }
  0x3f   : > { %v266_v7 = vld [vmem:[%s982_s1] sm:$0xff]  ;;  %v551_v8 = vpack.c.bf16 %v265_v6, %v264_v4  ;;  %v365_v12 = vld [vmem:[%s984_s3 + $0x8] sm:$0xff]  ;;  %v392_v30 = vshrl.u32 %v391_v27, 7  ;;  %s425_s15 = sshll.u32 %s261_s30, 4  ;;  %s411_s23 = scalar_lea.sflag [#allocation5], %s894_s26  ;;  %s932_s15 = int_to_ptr.vmem [resolvable:$true] %s425_s15 }
  0x40   : > { %544 = vmatprep.mubr.msk.f32.mxu0 %vm280_vm0, %v266_v7  ;;  %v268_v9 = vld [vmem:[%s983_s2] sm:$0xff]  ;;  %548 = vmatprep.subr.bf16.mxu0 %v547_v5  ;;  %v267_v13 = vld [vmem:[%s982_s1 + $0x8] sm:$0xff]  ;;  %s658_s28 = scalar_lea.vmem %s932_s15, 512  ;;  %p994_p9 = scmp.ne.s32.totalorder %s990_s7, 0 }
  0x41   : > { %v364_v10 = vld [vmem:[%s984_s3] sm:$0xff]  ;;  %272 = vperm.xlu0 %622, %v268_v9   ;;  %550 = vmatpush3.bf16.msra.mxu0 %v547_v5  ;;  %v393_v33 = vsub.s32 0, %v392_v30  ;;  %p659_p8 = scmp.ne.s32.totalorder %s932_s15, %s658_s28  ;;  %s746_s6 = smov [#allocation6]  }
  0x42   : > { %368 = vperm.xlu1 %623, %v364_v10   ;;  %552 = vmatprep.subr.bf16.mxu0 %v551_v8  ;;  %v385_v14 = vld [vmem:[#allocation2] sm:$0x1]  ;;  %s662_s11 = sshll.u32 %s746_s6, 4  ;;  %s663_s11 = int_to_ptr.vmem [resolvable:$false] %s662_s11 }
  0x43   : > { %p660_p11 = pnand %p659_p8, %p994_p9  ;;  %s664_s10 = scalar_lea.vmem %s663_s11, 1024 }
  0x44   : > { %p665_p6 = scmp.lt.s32.totalorder %s932_s15, %s663_s11  ;;  %p666_p13 = scmp.lt.s32.totalorder %s664_s10, %s658_s28 }
  0x45   : > { %277 = vperm.xlu0 %622, %v269_v11   ;;  %554 = vmatpush3.bf16.msra.mxu0 %v551_v8  ;;  %p661_p0 = pneg %p660_p11 }
  0x46   : > { %373 = vperm.xlu1 %623, %v365_v12   ;;  %p667_p2 = por %p666_p13, %p665_p6 }
  0x48   : > { %545 = vmatmul.mubr.msk.f32.vlgmr.msra.gmra.mrb[0].mxu0 %vm280_vm0, %v267_v13  ;;  %p668_p5 = pnand %p667_p2, %p661_p0 }
  0x49   : > { %388 = vperm.xlu0 %622, %v385_v14  }
  0xc0   : > { %v273_v15 = vpop.permute.xlu0 %272 }
  0xc1   : > { %v369_v16 = vpop.permute.xlu1 %368 }
  0xc4   : > { %v278_v17 = vpop.permute.xlu0 %277 }
  0xc5   : > { %v374_v23 = vpop.permute.xlu1 %373 }
  0xc8   : > { %v389_v35 = vpop.permute.xlu0 %388 }
  0xc9   : > { %v394_v37 = vrot.slane %v389_v35, %v393_v33 }
 0x11b   : > { %v546_v18 = vpop.f32.mrb[0].mxu0 }
 0x11c   : > { %v359_v19 = vadd.f32 %v546_v18, %v278_v17  ;;  %v353_v20 = vpop.f32.mrb[1].mxu0 }
 0x11d   : > { %v354_v21 = vadd.f32 %v353_v20, %v273_v15 }
 0x11e   : > { %v363_v22 = vmax.f32 %v359_v19, 0.0 }
 0x11f   : > { %v362_v24 = vmax.f32 %v354_v21, 0.0 }
 0x120   : > { %v377_v25 = vmul.f32 %v374_v23, %v363_v22 }
 0x121   : > { %v376_v26 = vmul.f32 %v369_v16, %v362_v24 }
 0x123   : > { %v378_v28 = vadd.f32 %v377_v25, %v376_v26 }
 0x125   : > { %v379_v29 = vrot.slane %v378_v28, 4 }
 0x127   : > { %v380_v31 = vadd.f32 %v379_v29, %v378_v28 }
 0x129   : > { %v381_v32 = vrot.slane %v380_v31, 2 }
 0x12b   : > { %v382_v34 = vadd.f32 %v381_v32, %v380_v31 }
 0x12d   : > { %v383_v36 = vrot.slane %v382_v34, 1 }
 0x12f   : > { %v384_v38 = vadd.f32 %v383_v36, %v382_v34 }
 0x131   : > { %v395_v39 = vadd.f32 %v394_v37, %v384_v38 }
 0x133   : > { %v522_v40 = vmul.f32 -1.442695, %v395_v39 }
 0x135   : > { %624 = vpow2.f32 %v522_v40 }
 0x13f   : > { %v625_v41 = vpop.eup %624 }
 0x140   : > { %v399_v42 = vadd.f32 1.0, %v625_v41 }
 0x142   : > { %626 = vrcp.f32 %v399_v42 }
 0x14c   : > { %v627_v43 = vpop.eup %626 }
 0x14d   : > { %v402_v44 = vmul.f32 %v627_v43, %v262_v2  ;;  %v403_v45 = vmul.f32 %v627_v43, %v263_v3  ;;  %v404_v46 = vmul.f32 %v627_v43, %v264_v4  ;;  %v405_v47 = vmul.f32 %v627_v43, %v265_v6 }
 0x14f   : > { %406 = vst [vmem:[%s261_s30] sm:$0xff] %v402_v44  ;;  %407 = vst [vmem:[%s261_s30 + $0x8] sm:$0xff] %v403_v45 }
 0x150   : > { %408 = vst [vmem:[%s261_s30 + $0x10] sm:$0xff] %v404_v46  ;;  %409 = vst [vmem:[%s261_s30 + $0x18] sm:$0xff] %v405_v47 }
 0x151   : > { %671 = shalt.err (!%p668_p5)
}
 0x152   : > { %s672_s12 = scalar_lea.hbm %s930_s19, 512  ;;  %s676_s16 = scalar_lea.hbm %s986_s5, 1024 }
 0x153   : > { %p673_p4 = scmp.ne.s32.totalorder %s930_s19, %s672_s12  ;;  %p677_p12 = scmp.lt.u32.totalorder %s930_s19, %s986_s5 }
 0x154   : > { %p678_p1 = scmp.lt.u32.totalorder %s676_s16, %s672_s12  ;;  %p680_p8 = scmp.lt.u32.totalorder %s672_s12, %s930_s19 }
 0x155   : > { %p674_p7 = pnand %p673_p4, %p994_p9 }
 0x156   : > { %p679_p3 = por %p678_p1, %p677_p12 }
 0x157   : > { %p675_p10 = pneg %p674_p7 }
 0x158   : > { %p681_p11 = por %p680_p8, %p679_p3 }
 0x15a   : > { %p682_p0 = pnand %p681_p11, %p675_p10 }
 0x15c   : > { %685 = shalt.err (!%p682_p0)
}
 0x15d   : > { %s747_s30 = smov 128   ;;  %s748_s17 = smov 8  }
 0x15e   : > { %557 = dma.vmem_to_hbm [thread:$0]  (%p994_p9), %s932_s15, 512, %s930_s19, %s411_s23, %s747_s30, %s747_s30, %s748_s17  }
 0x15f PF: > { %s440_s18 = sand.u32 1, %s720_s20   ;;  %p995_p6 = scmp.ne.s32.totalorder %s991_s9, 0 }
 0x160   : > { %p996_p13 = scmp.ge.s32.totalorder %s740_s25, 2  ;;  %s441_s28 = scalar_lea.sflag [#allocation5], %s440_s18 }
 0x162   : > { %p564_p2 = pnand %p996_p13, %p995_p6 }
 0x164   : > { %715 = dma.done.wait (!%p564_p2), %s441_s28, 512  }
 0x165   : > { %717 = vsyncadd (!%p564_p2), %s441_s28, 4294966784  ;;  %s23_s25 = sadd.s32 1, %s740_s25   ;;  %s997_s20 = smov %s724_s21 }
 0x166   : > { %p20_p5 = scmp.ge.s32.totalorder %s23_s25, 4   ;;  %s998_s21 = smov %s728_s22 }
 0x167   : > { %s999_s22 = smov %s838_s8  ;;  %s1000_s23 = smov %s736_s24 }
 0x168   : > { %s1001_s24 = smov %s1003_s27  ;;  %22 = sbr.rel (!%p20_p5) target bundleno = 9 (0x9), region = 85 }
 0x16f   :  { %446 = vsyncpa [#allocation4], 1 }
 0x170   :  { %448 = vsyncpa [#allocation4 + $0x1], 1 }
 0x171   :  { %449 = vsyncpa [#allocation5], 1 }
 0x172   :  { %451 = vsyncpa [#allocation5 + $0x1], 1 }

</bundles_post_ra>
